<compile_context>
chip_gen: v6e
topology: v6e:2x2x1
jax: 0.10.0
libtpu: 0.0.40
codegen_flags: <defaults>
</compile_context>

<pallas_src>
import functools

import jax
import jax.numpy as jnp
import numpy as np
from jax.experimental import pallas as pl
from jax.experimental.pallas import tpu as pltpu


def _cdiv(a, b):
    return -(-a // b)


def _round_up(a, m):
    return _cdiv(a, m) * m


def _pvq_kernel(lat_ref, wcos_ref, wemb_ref, xq_ref, loss_ref, idx_ref, *,
                tau, n_rows, block_rows, codebook_num, codebook_size,
                codebook_dim):
    C, K, D = codebook_num, codebook_size, codebook_dim
    eps = jnp.float32(1e-12)          # F.normalize default eps
    inv_tau = jnp.float32(1.0 / tau)

    lat = lat_ref[...]                                        # (TN, C*D) f32

    # --- F.normalize(latent_chunk, dim=-1) in f32, cast operands to bf16 for the MXU ---
    norm_chunks = []
    for c in range(C):
        lat_c = lat[:, c * D:(c + 1) * D]
        nrm = jnp.sqrt(jnp.sum(lat_c * lat_c, axis=-1, keepdims=True))
        norm_chunks.append((lat_c / jnp.maximum(nrm, eps)).astype(jnp.bfloat16))
    l_norm = jnp.concatenate(norm_chunks, axis=-1)            # (TN, C*D) bf16

    # --- all codebooks in one lane-dense MXU matmul: (TN, C*D) @ (C*D, C*K) -> (TN, C*K) ---
    cos_all = jnp.dot(l_norm, wcos_ref[...],
                      preferred_element_type=jnp.float32)     # (TN, C*K) f32

    # Validity mask for rows padded beyond N (only emitted when a tile can contain padding).
    needs_mask = (n_rows % block_rows) != 0
    if needs_mask:
        row_ids = (jax.lax.broadcasted_iota(jnp.int32, (block_rows, 1), 0)
                   + pl.program_id(0) * block_rows)
        valid = (row_ids < n_rows).astype(jnp.float32)        # (TN, 1)

    col_ids = jax.lax.broadcasted_iota(jnp.int32, (block_rows, K), 1)
    onehots, idxs, losses = [], [], []
    for c in range(C):
        cos_c = cos_all[:, c * K:(c + 1) * K]                 # (TN, K)
        row_max = jnp.max(cos_c, axis=-1, keepdims=True)      # (TN, 1)
        # argmin((1 - cos)/tau) == argmax(cos); first occurrence on ties (torch.argmin).
        idx_c = jnp.min(jnp.where(cos_c == row_max, col_ids, K),
                        axis=-1, keepdims=True)               # (TN, 1) int32
        onehots.append((col_ids == idx_c).astype(jnp.float32))
        idxs.append(idx_c)
        # CE(cos/tau, argmax): target logit == rowmax/tau, so per-row loss reduces to
        # log(sum_j exp((cos_j - rowmax)/tau))   (drops one (TN,K) mul + one row-reduce).
        lse_res = jnp.log(jnp.sum(jnp.exp((cos_c - row_max) * inv_tau),
                                  axis=-1, keepdims=True))    # (TN, 1)
        if needs_mask:
            lse_res = lse_res * valid
        losses.append(jnp.sum(lse_res).reshape(1, 1))         # partial sum over tile rows

    # --- x_q = embedding[idx] for all codebooks via one one-hot MXU matmul (f32, exact) ---
    onehot_all = jnp.concatenate(onehots, axis=-1)            # (TN, C*K) f32
    x_q = jnp.dot(onehot_all, wemb_ref[...],
                  preferred_element_type=jnp.float32)         # (TN, C*D)

    xq_ref[...] = x_q.astype(xq_ref.dtype)                    # lane-dense store
    idx_ref[...] = jnp.concatenate(idxs, axis=-1)             # (TN, C) int32
    loss_ref[...] = jnp.concatenate(losses, axis=-1).reshape(1, 1, C)


def product_vector_quantizer(x, embeddings, *, tau=0.2, block_rows=1024):
    """Eval-mode ProductVectorQuantizer forward (dist='cos', vq_ema=False).

    x:          (..., C*D) float array.
    embeddings: (C, K, D) float array (stacked per-quantizer codebooks).
    Returns (x_q, mean_commit_loss, codes).
    """
    C, K, D = embeddings.shape
    lead_shape = x.shape[:-1]
    assert x.shape[-1] == C * D
    N = int(np.prod(lead_shape)) if lead_shape else 1

    lat = x.reshape(N, C * D).astype(jnp.float32)             # contiguous: no copy

    # N tiling: pick tile rows (multiple of 8) so padding waste is < 8 rows per tile.
    n_tiles = _cdiv(N, block_rows)
    tn = _round_up(_cdiv(N, n_tiles), 8)
    n_pad = n_tiles * tn
    if n_pad != N:
        lat = jnp.pad(lat, ((0, n_pad - N), (0, 0)))          # zero rows -> masked in loss

    emb = embeddings.astype(jnp.float32)
    # F.normalize(embedding, dim=-1), hoisted out of the per-tile loop (computed once).
    e_norm = emb / jnp.maximum(
        jnp.sqrt(jnp.sum(emb * emb, axis=-1, keepdims=True)), 1e-12)

    # Block-diagonal codebook matrices so all C codebooks share one MXU matmul per tile.
    #   w_cos[c*D + d, f*K + k] = e_norm[c, k, d] * (c == f)   (bf16 MXU operand)
    #   w_emb[f*K + k, c*D + d] = emb[c, k, d]    * (c == f)   (f32, exact gather)
    eye_c = jnp.eye(C, dtype=jnp.float32)
    w_cos = jnp.einsum('cf,ckd->cdfk', eye_c, e_norm).reshape(
        C * D, C * K).astype(jnp.bfloat16)
    w_emb = jnp.einsum('cf,ckd->fkcd', eye_c, emb).reshape(C * K, C * D)

    # VMEM budget: per-tile footprint with headroom, bounded by physical VMEM (64 MiB on v7x).
    lane = 128
    est = (2 * 2 * tn * _round_up(C * D, lane) * 4            # lat in + x_q out (double-buffered)
           + 2 * tn * _round_up(C, lane) * 4                  # idx out
           + 2 * _round_up(C * D, 16) * _round_up(C * K, lane) * 2   # w_cos (bf16)
           + 2 * _round_up(C * K, 8) * _round_up(C * D, lane) * 4    # w_emb
           + 6 * tn * _round_up(C * K, lane) * 4              # in-kernel temporaries
           + (1 << 20))
    try:
        phys_vmem = int(pltpu.get_tpu_info().vmem_capacity_bytes)
    except Exception:
        phys_vmem = 64 * 1024 * 1024
    vmem_limit = int(min(int(phys_vmem * 3 // 4),
                         max(32 * 1024 * 1024, 2 * est)))

    kernel = functools.partial(
        _pvq_kernel, tau=tau, n_rows=N, block_rows=tn,
        codebook_num=C, codebook_size=K, codebook_dim=D)

    xq_all, loss_all, idx_all = pl.pallas_call(
        kernel,
        out_shape=(
            jax.ShapeDtypeStruct((n_pad, C * D), jnp.float32),
            jax.ShapeDtypeStruct((n_tiles, 1, C), jnp.float32),
            jax.ShapeDtypeStruct((n_pad, C), jnp.int32),
        ),
        grid_spec=pltpu.PrefetchScalarGridSpec(
            num_scalar_prefetch=0,
            grid=(n_tiles,),
            in_specs=[
                pl.BlockSpec((tn, C * D), lambda i: (i, 0)),
                pl.BlockSpec((C * D, C * K), lambda i: (0, 0)),
                pl.BlockSpec((C * K, C * D), lambda i: (0, 0)),
            ],
            out_specs=[
                pl.BlockSpec((tn, C * D), lambda i: (i, 0)),
                pl.BlockSpec((1, 1, C), lambda i: (i, 0, 0)),
                pl.BlockSpec((tn, C), lambda i: (i, 0)),
            ],
        ),
        compiler_params=pltpu.CompilerParams(
            dimension_semantics=("parallel",),
            vmem_limit_bytes=vmem_limit),
    )(lat, w_cos, w_emb)

    # torch.cat(all_x_q, dim=-1) / torch.stack(all_codes, dim=-1) — layout is already native.
    x_q = xq_all[:N].reshape(lead_shape + (C * D,))
    codes = idx_all[:N].reshape(lead_shape + (C,))
    # each per-codebook loss is a mean over N rows; the module then means over C quantizers.
    mean_loss = jnp.sum(loss_all) / jnp.float32(N * C)
    return x_q, mean_loss, codes


def _reference(x, embeddings, tau=0.2):
    """Plain-JAX reference of the eval-mode forward.  Uses the same bf16 operand /
    f32-accumulate precision for the cosine matmul as the kernel's MXU path."""
    C, K, D = embeddings.shape
    lead = x.shape[:-1]
    chunks = jnp.split(x.astype(jnp.float32), C, axis=-1)
    emb = embeddings.astype(jnp.float32)
    xqs, losses, codes = [], [], []
    for c in range(C):
        lat = chunks[c].reshape(-1, D)
        e = emb[c]
        ln = lat / jnp.maximum(jnp.linalg.norm(lat, axis=-1, keepdims=True), 1e-12)
        en = e / jnp.maximum(jnp.linalg.norm(e, axis=-1, keepdims=True), 1e-12)
        cos = jnp.dot(ln.astype(jnp.bfloat16), en.astype(jnp.bfloat16).T,
                      preferred_element_type=jnp.float32)
        idx = jnp.argmax(cos, axis=-1)
        xq = e[idx]
        logits = cos / tau
        lse = jax.scipy.special.logsumexp(logits, axis=-1)
        loss = jnp.mean(lse - jnp.take_along_axis(logits, idx[:, None], axis=1)[:, 0])
        xqs.append(xq.reshape(lead + (D,)))
        losses.append(loss)
        codes.append(idx.reshape(lead))
    return (jnp.concatenate(xqs, axis=-1),
            jnp.mean(jnp.stack(losses)),
            jnp.stack(codes, axis=-1))


if __name__ == "__main__":
    # ProductVectorQuantizer(codebook_num=2, codebook_size=16, codebook_dim=32, dist='cos', tau=0.2)
    codebook_num, codebook_size, codebook_dim, tau = 2, 16, 32, 0.2
    key = jax.random.PRNGKey(0)
    kx, ke = jax.random.split(key)
    x = jax.random.normal(kx, (2, 9, codebook_num * codebook_dim), dtype=jnp.float32)
    embeddings = jax.random.normal(
        ke, (codebook_num, codebook_size, codebook_dim), dtype=jnp.float32)

    xr, lr, cr = _reference(x, embeddings, tau=tau)

    # Single-tile path (default block size) and multi-tile path (tiny tiles, exercises
    # N padding + masked loss accumulation across grid steps).
    for br in (1024, 8):
        x_q, loss, codes = product_vector_quantizer(x, embeddings, tau=tau, block_rows=br)
        jax.block_until_ready((x_q, loss, codes))
        np.testing.assert_allclose(np.asarray(x_q), np.asarray(xr), rtol=1e-4, atol=1e-4)
        np.testing.assert_allclose(np.asarray(loss), np.asarray(lr), rtol=1e-3, atol=1e-3)
        np.testing.assert_array_equal(np.asarray(codes), np.asarray(cr))

    print("KERNEL_OK")
</pallas_src>

<mosaic_0001>
module attributes {stable_mosaic.version = 11 : i64} {
  func.func @_pvq_kernel(%arg0: i32, %arg1: memref<24x64xf32, #tpu.memory_space<vmem>>, %arg2: memref<64x32xbf16, #tpu.memory_space<vmem>>, %arg3: memref<32x64xf32, #tpu.memory_space<vmem>>, %arg4: memref<24x64xf32, #tpu.memory_space<vmem>>, %arg5: memref<1x1x2xf32, #tpu.memory_space<vmem>>, %arg6: memref<24x2xi32, #tpu.memory_space<vmem>>) attributes {dimension_semantics = [#tpu.dimension_semantics<parallel>], iteration_bounds = array<i64: 1>, scalar_prefetch = 0 : i64, scratch_operands = 0 : i64, tpu.core_type = #tpu.core_type<tc>, window_params = [{transform_indices = @transform_0, window_bounds = array<i64: 24, 64>}, {pipeline_mode = #tpu.pipeline_mode<synchronous>, transform_indices = @transform_1, window_bounds = array<i64: 64, 32>}, {pipeline_mode = #tpu.pipeline_mode<synchronous>, transform_indices = @transform_2, window_bounds = array<i64: 32, 64>}, {transform_indices = @transform_3, window_bounds = array<i64: 24, 64>}, {transform_indices = @transform_4, window_bounds = array<i64: 1, 1, 2>}, {transform_indices = @transform_5, window_bounds = array<i64: 24, 2>}]} {
    %c0 = arith.constant 0 : index
    %c0_0 = arith.constant 0 : index
    %0 = vector.load %arg1[%c0, %c0_0] : memref<24x64xf32, #tpu.memory_space<vmem>>, vector<24x64xf32>
    %1 = vector.extract_strided_slice %0 {offsets = [0, 0], sizes = [24, 32], strides = [1, 1]} : vector<24x64xf32> to vector<24x32xf32>
    %2 = arith.mulf %1, %1 : vector<24x32xf32>
    %cst = arith.constant dense<0.000000e+00> : vector<24xf32>
    %3 = vector.multi_reduction <add>, %2, %cst [1] : vector<24x32xf32> to vector<24xf32>
    %4 = vector.shape_cast %3 : vector<24xf32> to vector<24x1xf32>
    %5 = math.sqrt %4 : vector<24x1xf32>
    %cst_1 = arith.constant 9.99999996E-13 : f32
    %6 = vector.broadcast %cst_1 : f32 to vector<24x1xf32>
    %7 = arith.maximumf %5, %6 : vector<24x1xf32>
    %8 = vector.broadcast %7 : vector<24x1xf32> to vector<24x32xf32>
    %9 = arith.divf %1, %8 : vector<24x32xf32>
    %10 = arith.truncf %9 : vector<24x32xf32> to vector<24x32xbf16>
    %11 = vector.extract_strided_slice %0 {offsets = [0, 32], sizes = [24, 32], strides = [1, 1]} : vector<24x64xf32> to vector<24x32xf32>
    %12 = arith.mulf %11, %11 : vector<24x32xf32>
    %cst_2 = arith.constant dense<0.000000e+00> : vector<24xf32>
    %13 = vector.multi_reduction <add>, %12, %cst_2 [1] : vector<24x32xf32> to vector<24xf32>
    %14 = vector.shape_cast %13 : vector<24xf32> to vector<24x1xf32>
    %15 = math.sqrt %14 : vector<24x1xf32>
    %cst_3 = arith.constant 9.99999996E-13 : f32
    %16 = vector.broadcast %cst_3 : f32 to vector<24x1xf32>
    %17 = arith.maximumf %15, %16 : vector<24x1xf32>
    %18 = vector.broadcast %17 : vector<24x1xf32> to vector<24x32xf32>
    %19 = arith.divf %11, %18 : vector<24x32xf32>
    %20 = arith.truncf %19 : vector<24x32xf32> to vector<24x32xbf16>
    %21 = tpu.concatenate %10, %20 in 1 : vector<24x32xbf16>, vector<24x32xbf16> -> vector<24x64xbf16>
    %c0_4 = arith.constant 0 : index
    %c0_5 = arith.constant 0 : index
    %22 = vector.load %arg2[%c0_4, %c0_5] : memref<64x32xbf16, #tpu.memory_space<vmem>>, vector<64x32xbf16>
    %cst_6 = arith.constant dense<0.000000e+00> : vector<24x32xf32>
    %23 = tpu.matmul %21, %22, %cst_6 {dimension_numbers = #tpu.dot_dimension_numbers<[1], [0], [0], [1], [0, 0, 1, 1], [], []>} : vector<24x64xbf16>, vector<64x32xbf16>, vector<24x32xf32> -> vector<24x32xf32>
    %24 = tpu.iota {dimensions = array<i32: 0>} : vector<24x1xi32>
    %c24_i32 = arith.constant 24 : i32
    %25 = arith.muli %arg0, %c24_i32 : i32
    %26 = vector.broadcast %25 : i32 to vector<24x1xi32>
    %27 = arith.addi %24, %26 : vector<24x1xi32>
    %c18_i32 = arith.constant 18 : i32
    %28 = vector.broadcast %c18_i32 : i32 to vector<24x1xi32>
    %29 = arith.cmpi slt, %27, %28 : vector<24x1xi32>
    %30 = arith.extui %29 : vector<24x1xi1> to vector<24x1xi32>
    %31 = arith.sitofp %30 : vector<24x1xi32> to vector<24x1xf32>
    %32 = tpu.iota {dimensions = array<i32: 1>} : vector<24x16xi32>
    %33 = vector.extract_strided_slice %23 {offsets = [0, 0], sizes = [24, 16], strides = [1, 1]} : vector<24x32xf32> to vector<24x16xf32>
    %cst_7 = arith.constant dense<0xFF800000> : vector<24xf32>
    %34 = vector.multi_reduction <maximumf>, %33, %cst_7 [1] : vector<24x16xf32> to vector<24xf32>
    %35 = vector.shape_cast %34 : vector<24xf32> to vector<24x1xf32>
    %36 = vector.broadcast %35 : vector<24x1xf32> to vector<24x16xf32>
    %37 = arith.cmpf oeq, %33, %36 : vector<24x16xf32>
    %c16_i32 = arith.constant 16 : i32
    %38 = vector.broadcast %c16_i32 : i32 to vector<24x16xi32>
    %39 = arith.select %37, %32, %38 : vector<24x16xi1>, vector<24x16xi32>
    %cst_8 = arith.constant dense<2147483647> : vector<24xi32>
    %40 = vector.multi_reduction <minsi>, %39, %cst_8 [1] : vector<24x16xi32> to vector<24xi32>
    %41 = vector.shape_cast %40 : vector<24xi32> to vector<24x1xi32>
    %42 = vector.broadcast %41 : vector<24x1xi32> to vector<24x16xi32>
    %43 = arith.cmpi eq, %32, %42 : vector<24x16xi32>
    %44 = arith.extui %43 : vector<24x16xi1> to vector<24x16xi32>
    %45 = arith.sitofp %44 : vector<24x16xi32> to vector<24x16xf32>
    %46 = vector.broadcast %35 : vector<24x1xf32> to vector<24x16xf32>
    %47 = arith.subf %33, %46 : vector<24x16xf32>
    %cst_9 = arith.constant 5.000000e+00 : f32
    %48 = vector.broadcast %cst_9 : f32 to vector<24x16xf32>
    %49 = arith.mulf %47, %48 : vector<24x16xf32>
    %50 = math.exp %49 : vector<24x16xf32>
    %cst_10 = arith.constant dense<0.000000e+00> : vector<24xf32>
    %51 = vector.multi_reduction <add>, %50, %cst_10 [1] : vector<24x16xf32> to vector<24xf32>
    %52 = vector.shape_cast %51 : vector<24xf32> to vector<24x1xf32>
    %53 = math.log %52 : vector<24x1xf32>
    %54 = arith.mulf %53, %31 : vector<24x1xf32>
    %55 = vector.shape_cast %54 : vector<24x1xf32> to vector<1x24x1xf32>
    %cst_11 = arith.constant dense<0.000000e+00> : vector<1xf32>
    %56 = vector.multi_reduction <add>, %55, %cst_11 [1, 2] : vector<1x24x1xf32> to vector<1xf32>
    %57 = vector.shape_cast %56 : vector<1xf32> to vector<1x1x1xf32>
    %58 = vector.extract %57[0, 0, 0] : f32 from vector<1x1x1xf32>
    %59 = vector.broadcast %58 : f32 to vector<1x1xf32>
    %60 = vector.extract_strided_slice %23 {offsets = [0, 16], sizes = [24, 16], strides = [1, 1]} : vector<24x32xf32> to vector<24x16xf32>
    %cst_12 = arith.constant dense<0xFF800000> : vector<24xf32>
    %61 = vector.multi_reduction <maximumf>, %60, %cst_12 [1] : vector<24x16xf32> to vector<24xf32>
    %62 = vector.shape_cast %61 : vector<24xf32> to vector<24x1xf32>
    %63 = vector.broadcast %62 : vector<24x1xf32> to vector<24x16xf32>
    %64 = arith.cmpf oeq, %60, %63 : vector<24x16xf32>
    %c16_i32_13 = arith.constant 16 : i32
    %65 = vector.broadcast %c16_i32_13 : i32 to vector<24x16xi32>
    %66 = arith.select %64, %32, %65 : vector<24x16xi1>, vector<24x16xi32>
    %cst_14 = arith.constant dense<2147483647> : vector<24xi32>
    %67 = vector.multi_reduction <minsi>, %66, %cst_14 [1] : vector<24x16xi32> to vector<24xi32>
    %68 = vector.shape_cast %67 : vector<24xi32> to vector<24x1xi32>
    %69 = vector.broadcast %68 : vector<24x1xi32> to vector<24x16xi32>
    %70 = arith.cmpi eq, %32, %69 : vector<24x16xi32>
    %71 = arith.extui %70 : vector<24x16xi1> to vector<24x16xi32>
    %72 = arith.sitofp %71 : vector<24x16xi32> to vector<24x16xf32>
    %73 = vector.broadcast %62 : vector<24x1xf32> to vector<24x16xf32>
    %74 = arith.subf %60, %73 : vector<24x16xf32>
    %cst_15 = arith.constant 5.000000e+00 : f32
    %75 = vector.broadcast %cst_15 : f32 to vector<24x16xf32>
    %76 = arith.mulf %74, %75 : vector<24x16xf32>
    %77 = math.exp %76 : vector<24x16xf32>
    %cst_16 = arith.constant dense<0.000000e+00> : vector<24xf32>
    %78 = vector.multi_reduction <add>, %77, %cst_16 [1] : vector<24x16xf32> to vector<24xf32>
    %79 = vector.shape_cast %78 : vector<24xf32> to vector<24x1xf32>
    %80 = math.log %79 : vector<24x1xf32>
    %81 = arith.mulf %80, %31 : vector<24x1xf32>
    %82 = vector.shape_cast %81 : vector<24x1xf32> to vector<1x24x1xf32>
    %cst_17 = arith.constant dense<0.000000e+00> : vector<1xf32>
    %83 = vector.multi_reduction <add>, %82, %cst_17 [1, 2] : vector<1x24x1xf32> to vector<1xf32>
    %84 = vector.shape_cast %83 : vector<1xf32> to vector<1x1x1xf32>
    %85 = vector.extract %84[0, 0, 0] : f32 from vector<1x1x1xf32>
    %86 = vector.broadcast %85 : f32 to vector<1x1xf32>
    %87 = tpu.concatenate %45, %72 in 1 : vector<24x16xf32>, vector<24x16xf32> -> vector<24x32xf32>
    %c0_18 = arith.constant 0 : index
    %c0_19 = arith.constant 0 : index
    %88 = vector.load %arg3[%c0_18, %c0_19] : memref<32x64xf32, #tpu.memory_space<vmem>>, vector<32x64xf32>
    %cst_20 = arith.constant dense<0.000000e+00> : vector<24x64xf32>
    %89 = tpu.matmul %87, %88, %cst_20 {dimension_numbers = #tpu.dot_dimension_numbers<[1], [0], [0], [1], [0, 0, 1, 1], [], []>} : vector<24x32xf32>, vector<32x64xf32>, vector<24x64xf32> -> vector<24x64xf32>
    %c0_21 = arith.constant 0 : index
    %c0_22 = arith.constant 0 : index
    %90 = vector.load %arg4[%c0_21, %c0_22] : memref<24x64xf32, #tpu.memory_space<vmem>>, vector<24x64xf32>
    tpu.vector_store %arg4[%c0_21, %c0_22], %89 {strides = array<i32>} : memref<24x64xf32, #tpu.memory_space<vmem>>, vector<24x64xf32>,
    %91 = tpu.concatenate %41, %68 in 1 : vector<24x1xi32>, vector<24x1xi32> -> vector<24x2xi32>
    %c0_23 = arith.constant 0 : index
    %c0_24 = arith.constant 0 : index
    %92 = vector.load %arg6[%c0_23, %c0_24] : memref<24x2xi32, #tpu.memory_space<vmem>>, vector<24x2xi32>
    tpu.vector_store %arg6[%c0_23, %c0_24], %91 {strides = array<i32>} : memref<24x2xi32, #tpu.memory_space<vmem>>, vector<24x2xi32>,
    %93 = tpu.concatenate %59, %86 in 1 : vector<1x1xf32>, vector<1x1xf32> -> vector<1x2xf32>
    %94 = vector.shape_cast %93 : vector<1x2xf32> to vector<1x1x2xf32>
    %c0_25 = arith.constant 0 : index
    %c0_26 = arith.constant 0 : index
    %c0_27 = arith.constant 0 : index
    %95 = vector.load %arg5[%c0_25, %c0_26, %c0_27] : memref<1x1x2xf32, #tpu.memory_space<vmem>>, vector<1x1x2xf32>
    tpu.vector_store %arg5[%c0_25, %c0_26, %c0_27], %94 {strides = array<i32>} : memref<1x1x2xf32, #tpu.memory_space<vmem>>, vector<1x1x2xf32>,
    return
  }
  func.func @transform_0(%arg0: i32) -> (i32, i32) {
    %c0_i32 = arith.constant 0 : i32
    %c0_i32_0 = arith.constant 0 : i32
    return %arg0, %c0_i32 : i32, i32
  }
  func.func @transform_1(%arg0: i32) -> (i32, i32) {
    %c0_i32 = arith.constant 0 : i32
    %c0_i32_0 = arith.constant 0 : i32
    %c0_i32_1 = arith.constant 0 : i32
    return %c0_i32, %c0_i32_0 : i32, i32
  }
  func.func @transform_2(%arg0: i32) -> (i32, i32) {
    %c0_i32 = arith.constant 0 : i32
    %c0_i32_0 = arith.constant 0 : i32
    %c0_i32_1 = arith.constant 0 : i32
    return %c0_i32, %c0_i32_0 : i32, i32
  }
  func.func @transform_3(%arg0: i32) -> (i32, i32) {
    %c0_i32 = arith.constant 0 : i32
    %c0_i32_0 = arith.constant 0 : i32
    return %arg0, %c0_i32 : i32, i32
  }
  func.func @transform_4(%arg0: i32) -> (i32, i32, i32) {
    %c0_i32 = arith.constant 0 : i32
    %c0_i32_0 = arith.constant 0 : i32
    %c0_i32_1 = arith.constant 0 : i32
    return %arg0, %c0_i32, %c0_i32_0 : i32, i32, i32
  }
  func.func @transform_5(%arg0: i32) -> (i32, i32) {
    %c0_i32 = arith.constant 0 : i32
    %c0_i32_0 = arith.constant 0 : i32
    return %arg0, %c0_i32 : i32, i32
  }
}

</mosaic_0001>

<bundles_post_ra>
// kernel: tpu_custom_call.1
= control target key start
LH: loop header
LB: loop body
LE: loop exit
PB: predicated region body
PF: predicated region fallthrough
CT: control target
= control target key end

     0   :  { %11 = vsyncpa [#allocation3], 0  ;;  %s1095_s0 = inlined_call_operand.hbm [shape: f32[24,64], index: 0, kind: input, shape index: {}]   ;;  %s1096_s1 = inlined_call_operand.vmem [shape: bf16[64,32], index: 1, kind: input, shape index: {}]   ;;  %s1097_s2 = inlined_call_operand.vmem [shape: f32[32,64], index: 2, kind: input, shape index: {}]   ;;  %s1098_s3 = inlined_call_operand.hbm [shape: f32[24,64], index: 3, kind: output, shape index: {0}]   ;;  %s1099_s4 = inlined_call_operand.hbm [shape: f32[1,1,2], index: 4, kind: output, shape index: {1}]   ;;  %s1100_s5 = inlined_call_operand.vmem [shape: s32[24,2], index: 5, kind: output, shape index: {2}]  }
   0x1   :  { %12 = vsyncpa [#allocation4], 0 }
   0x2   :  { %13 = vsyncpa [#allocation7], 0  ;;  %s837_s18 = smov [#allocation2]  }
   0x3   :  { %s19_s19 = sshll.u32 %s837_s18, 4  ;;  %s20_s19 = int_to_ptr.vmem [resolvable:$true] %s19_s19 }
   0x4   :  { %s779_s20 = scalar_lea.vmem %s20_s19, 384  ;;  %p784_p1 = scmp.lt.s32.totalorder %s20_s19, %s20_s19 }
   0x5   :  { %p780_p0 = scmp.ne.s32.totalorder %s20_s19, %s779_s20  ;;  %p785_p2 = scmp.lt.s32.totalorder %s779_s20, %s779_s20 }
   0x7   :  { %p786_p3 = por %p785_p2, %p784_p1 }
   0x9   :  { %p787_p4 = pnand %p786_p3, %p780_p0 }
   0xb   :  { %790 = shalt.err (!%p787_p4)
}
   0xc   :  { %s838_s21 = smov 128   ;;  %s839_s22 = smov 8  }
   0xd   :  { %25 = dma.hbm_to_vmem [thread:$0]  %s1095_s0, 384, %s20_s19, [#allocation3], %s838_s21, %s838_s21, %s839_s22  }
   0xe   :  { %831 = dma.done.wait [#allocation3], 384  }
   0xf   :  { %832 = vsyncadd [#allocation3], 4294966912  ;;  %v883_v0 = vld [vmem:[#allocation2] sm:$0xff]  ;;  %v885_v1 = vld [vmem:[#allocation2 + $0x8] sm:$0xff]  ;;  %s840_s25 = smov 96   ;;  %vm40_vm0 = vcmask 261120  }
  0x10   :  { %v887_v2 = vld [vmem:[#allocation2 + $0x10] sm:$0xff]  ;;  %v37_v3 = vmul.f32 %v883_v0, %v883_v0  ;;  %v38_v5 = vmul.f32 %v885_v1, %v885_v1  ;;  %v719_v15 = vld [vmem:[%s1096_s1 + $0x18] sm:$0xff]   ;;  %v721_v17 = vld [vmem:[%s1096_s1 + $0x8] sm:$0xff]   ;;  %vm173_vm13 = vcmask 523264   ;;  %vm362_vm14 = vcmask 261248   ;;  %s842_s8 = smov 112  }
  0x11   :  { %v39_v4 = vmul.f32 %v887_v2, %v887_v2  ;;  %v720_v16 = vld [vmem:[%s1096_s1 + $0x10] sm:$0xff]   ;;  %676 = vmatprep.subr.bf16.mxu0 %v719_v15  ;;  %v722_v18 = vld [vmem:[%s1096_s1] sm:$0xff]   ;;  %vm246_vm15 = vcmask 130048   ;;  %s841_s1 = smov 16  }
  0x12   :  { %85 = vrot.lane.b32.xlu0 %v37_v3, %s840_s25  ;;  %v44_v6 = vsel %vm40_vm0, %v38_v5, 0.0  ;;  %v41_v7 = vsel %vm40_vm0, %v37_v3, 0.0  ;;  %677 = vmatpush3.bf16.msra.mxu0 %v719_v15 }
  0x13   :  { %89 = vrot.lane.b32.xlu1 %v39_v4, %s840_s25  ;;  %v47_v10 = vsel %vm40_vm0, %v39_v4, 0.0  ;;  %678 = vmatprep.subr.bf16.mxu0 %v720_v16 }
  0x16   :  { %87 = vrot.lane.b32.xlu0 %v38_v5, %s840_s25  ;;  %679 = vmatpush3.bf16.msra.mxu0 %v720_v16 }
  0x17   :  { %680 = vmatprep.subr.bf16.mxu0 %v721_v17 }
  0x1a   :  { %681 = vmatpush3.bf16.msra.mxu0 %v721_v17 }
  0x1b   :  { %682 = vmatprep.subr.bf16.mxu0 %v722_v18 }
  0x1e   :  { %683 = vmatpush3.bf16.msra.mxu0 %v722_v18 }
  0x35   :  { %45 = vadd.xlane.f32.xlu0 %v44_v6 }
  0x37   :  { %42 = vadd.xlane.f32.xlu1 %v41_v7 }
  0x84   :  { %v86_v8 = vpop.permute.xlu0 %85 }
  0x85   :  { %v94_v9 = vsel %vm40_vm0, %v86_v8, 0.0  ;;  %v90_v12 = vpop.permute.xlu1 %89 }
  0x86   :  { %95 = vadd.xlane.f32.xlu0 %v94_v9  ;;  %v100_v14 = vsel %vm40_vm0, %v90_v12, 0.0 }
  0x88   :  { %v88_v11 = vpop.permute.xlu0 %87 }
  0x89   :  { %v97_v13 = vsel %vm40_vm0, %v88_v11, 0.0 }
  0x8a   :  { %48 = vadd.xlane.f32.xlu0 %v47_v10  ;;  %98 = vadd.xlane.f32.xlu1 %v97_v13 }
  0x8e   :  { %101 = vadd.xlane.f32.xlu1 %v100_v14 }
  0xbe   :  { %v46_v19 = vpop.xlane.xlu0 %45 }
  0xbf   :  { %723 = vrsqrt.f32 %v46_v19  ;;  %vm59_vm1 = vcmp.eq.f32.partialorder %v46_v19, inf  ;;  %v62_v27 = vand.u32 2147483648, %v46_v19  ;;  %vm61_vm2 = vcmp.eq.f32.partialorder %v46_v19, 0.0 }
  0xc0   :  { %v43_v20 = vpop.xlane.xlu1 %42 }
  0xc1   :  { %725 = vrsqrt.f32 %v43_v20  ;;  %vm52_vm3 = vcmp.eq.f32.partialorder %v43_v20, inf  ;;  %v55_v31 = vand.u32 2147483648, %v43_v20  ;;  %vm54_vm4 = vcmp.eq.f32.partialorder %v43_v20, 0.0 }
  0xcc   :  { %v724_v22 = vpop.eup %723 }
  0xcd   :  { %v58_v26 = vmul.f32 %v724_v22, %v46_v19 }
  0xce   :  { %v726_v25 = vpop.eup %725 }
  0xcf   :  { %v51_v28 = vmul.f32 %v726_v25, %v43_v20  ;;  %v60_v30 = vsel %vm59_vm1, %v46_v19, %v58_v26 }
  0xd0   :  { %v63_v32 = vsel %vm61_vm2, %v62_v27, %v60_v30 }
  0xd1   :  { %v53_v33 = vsel %vm52_vm3, %v43_v20, %v51_v28  ;;  %v72_v35 = vmax.f32 %v63_v32, 1e-12 }
  0xd2   :  { %v56_v36 = vsel %vm54_vm4, %v55_v31, %v53_v33 }
  0xd3   :  { %v71_v41 = vmax.f32 %v56_v36, 1e-12 }
 0x10f   :  { %v96_v21 = vpop.xlane.xlu0 %95 }
 0x110   :  { %727 = vrsqrt.f32 %v96_v21  ;;  %vm105_vm5 = vcmp.eq.f32.partialorder %v96_v21, inf  ;;  %v108_v38 = vand.u32 2147483648, %v96_v21  ;;  %vm107_vm6 = vcmp.eq.f32.partialorder %v96_v21, 0.0 }
 0x113   :  { %v49_v23 = vpop.xlane.xlu0 %48  ;;  %v99_v24 = vpop.xlane.xlu1 %98 }
 0x114   :  { %729 = vrsqrt.f32 %v49_v23  ;;  %vm66_vm7 = vcmp.eq.f32.partialorder %v49_v23, inf  ;;  %v69_v46 = vand.u32 2147483648, %v49_v23  ;;  %vm68_vm8 = vcmp.eq.f32.partialorder %v49_v23, 0.0 }
 0x115   :  { %731 = vrsqrt.f32 %v99_v24  ;;  %vm112_vm9 = vcmp.eq.f32.partialorder %v99_v24, inf  ;;  %v115_v49 = vand.u32 2147483648, %v99_v24  ;;  %vm114_vm10 = vcmp.eq.f32.partialorder %v99_v24, 0.0 }
 0x117   :  { %v102_v29 = vpop.xlane.xlu1 %101 }
 0x118   :  { %733 = vrsqrt.f32 %v102_v29  ;;  %vm119_vm11 = vcmp.eq.f32.partialorder %v102_v29, inf  ;;  %v122_v57 = vand.u32 2147483648, %v102_v29  ;;  %vm121_vm12 = vcmp.eq.f32.partialorder %v102_v29, 0.0 }
 0x119   :  { %735 = vrcp.f32 %v72_v35 }
 0x11a   :  { %737 = vrcp.f32 %v71_v41 }
 0x11d   :  { %v728_v34 = vpop.eup %727 }
 0x11e   :  { %v104_v37 = vmul.f32 %v728_v34, %v96_v21 }
 0x120   :  { %v106_v39 = vsel %vm105_vm5, %v96_v21, %v104_v37 }
 0x121   :  { %v730_v40 = vpop.eup %729  ;;  %v109_v42 = vsel %vm107_vm6, %v108_v38, %v106_v39 }
 0x122   :  { %v732_v43 = vpop.eup %731  ;;  %v65_v44 = vmul.f32 %v730_v40, %v49_v23  ;;  %v124_v45 = vmax.f32 %v109_v42, 1e-12 }
 0x123   :  { %v111_v47 = vmul.f32 %v732_v43, %v99_v24 }
 0x124   :  { %v67_v48 = vsel %vm66_vm7, %v49_v23, %v65_v44  ;;  %739 = vrcp.f32 %v124_v45 }
 0x125   :  { %v734_v50 = vpop.eup %733  ;;  %v70_v51 = vsel %vm68_vm8, %v69_v46, %v67_v48  ;;  %v113_v52 = vsel %vm112_vm9, %v99_v24, %v111_v47  ;;  %v226_v24 = vlaneseq }
 0x126   :  { %v73_v53 = vmax.f32 %v70_v51, 1e-12  ;;  %v116_v54 = vsel %vm114_vm10, %v115_v49, %v113_v52  ;;  %v118_v55 = vmul.f32 %v734_v50, %v102_v29  ;;  %v736_v61 = vpop.eup %735 }
 0x127   :  { %v125_v56 = vmax.f32 %v116_v54, 1e-12  ;;  %v738_v62 = vpop.eup %737  ;;  %v77_v5 = vmul.f32 %v736_v61, %v885_v1  ;;  %v942_v26 = vand.u32 127, %v226_v24 }
 0x128   :  { %741 = vrcp.f32 %v73_v53  ;;  %v120_v58 = vsel %vm119_vm11, %v102_v29, %v118_v55  ;;  %v75_v4 = vmul.f32 %v738_v62, %v883_v0 }
 0x129   :  { %743 = vrcp.f32 %v125_v56  ;;  %v123_v59 = vsel %vm121_vm12, %v122_v57, %v120_v58 }
 0x12a   :  { %v126_v60 = vmax.f32 %v123_v59, 1e-12  ;;  %v80_v11 = vpack.c.bf16 %v77_v5, %v75_v4 }
 0x12c   :  { %745 = vrcp.f32 %v126_v60 }
 0x131   :  { %v740_v63 = vpop.eup %739 }
 0x132   :  { %v128_v7 = vmul.f32 %v740_v63, %v883_v0 }
 0x135   :  { %v742_v3 = vpop.eup %741 }
 0x136   :  { %v744_v6 = vpop.eup %743  ;;  %v79_v9 = vmul.f32 %v742_v3, %v887_v2 }
 0x137   :  { %v130_v8 = vmul.f32 %v744_v6, %v885_v1 }
 0x138   :  { %v81_v15 = vpack.c.bf16 %v79_v9, %v79_v9 }
 0x139   :  { %v746_v10 = vpop.eup %745  ;;  %v133_v12 = vpack.c.bf16 %v130_v8, %v128_v7 }
 0x13a   :  { %v132_v13 = vmul.f32 %v746_v10, %v887_v2 }
 0x13b   :  { %v137_v14 = vsel %vm40_vm0, %v80_v11, %v133_v12 }
 0x13c   :  { %684 = vmatprep.mubr.msk.bf16.mxu0 %vm173_vm13, %v137_v14  ;;  %v134_v16 = vpack.c.bf16 %v132_v13, %v132_v13 }
 0x13e   :  { %v140_v17 = vsel %vm40_vm0, %v81_v15, %v134_v16 }
 0x13f   :  { %685 = vmatmul.mubr.msk.bf16.vlgmr.msra.gmra.mxu0 %vm173_vm13, %v140_v17 }
 0x1ff   :  { %v923_v0 = vpop.f32.mrf.mxu0 }
 0x200   :  { %v369_v20 = vsel %vm362_vm14, %v923_v0, -inf  ;;  %v253_v23 = vsel %vm246_vm15, %v923_v0, -inf }
 0x201   :  { %v925_v1 = vpop.f32.mrf.mxu0 }
 0x202   :  { %v363_v18 = vsel %vm362_vm14, %v925_v1, -inf  ;;  %v247_v22 = vsel %vm246_vm15, %v925_v1, -inf }
 0x203   :  { %364 = vmax.xlane.f32.xlu0 %v363_v18  ;;  %v687_v2 = vpop.f32.mrf.mxu0 }
 0x205   :  { %v929_v19 = vpop.f32.mrf.mxu0 }
 0x206   :  { %v366_v21 = vsel %vm362_vm14, %v929_v19, -inf  ;;  %v250_v25 = vsel %vm246_vm15, %v929_v19, -inf }
 0x207   :  { %370 = vmax.xlane.f32.xlu0 %v369_v20  ;;  %367 = vmax.xlane.f32.xlu1 %v366_v21 }
 0x20b   :  { %248 = vmax.xlane.f32.xlu0 %v247_v22 }
 0x20f   :  { %254 = vmax.xlane.f32.xlu0 %v253_v23 }
 0x213   :  { %251 = vmax.xlane.f32.xlu0 %v250_v25  ;;  %v843_v25 = vmov 0.0  }
 0x214   :  { %688 = vmatprep.subr.mxu1 %v843_v25 }
 0x218   :  { %375 = vrot.lane.b32.xlu1 %v942_v26, %s841_s1 }
 0x28c   :  { %v365_v27 = vpop.xlane.xlu0 %364 }
 0x28d   :  { %vm372_vm1 = vcmp.eq.f32.partialorder %v925_v1, %v365_v27  ;;  %v434_v60 = vsub.f32 %v925_v1, %v365_v27 }
 0x28f   :  { %v437_v63 = vmul.f32 5.0, %v434_v60 }
 0x290   :  { %v946_v28 = vpop.xlane.xlu0 %370  ;;  %v368_v29 = vpop.xlane.xlu1 %367 }
 0x291   :  { %v435_v30 = vsub.f32 %v929_v19, %v368_v29  ;;  %vm374_vm2 = vcmp.eq.f32.partialorder %v923_v0, %v946_v28  ;;  %vm373_vm3 = vcmp.eq.f32.partialorder %v929_v19, %v368_v29  ;;  %v440_v3 = vmul.f32 1.442695, %v437_v63 }
 0x292   :  { %v436_v2 = vsub.f32 %v923_v0, %v946_v28 }
 0x293   :  { %v438_v36 = vmul.f32 5.0, %v435_v30 }
 0x294   :  { %v950_v31 = vpop.xlane.xlu0 %248  ;;  %v376_v32 = vpop.permute.xlu1 %375  ;;  %v439_v22 = vmul.f32 5.0, %v436_v2 }
 0x295   :  { %vm256_vm4 = vcmp.eq.f32.partialorder %v925_v1, %v950_v31  ;;  %v377_v33 = vsel %vm372_vm1, %v376_v32, 16  ;;  %v378_v34 = vsel %vm373_vm3, %v376_v32, 16  ;;  %v379_v35 = vsel %vm374_vm2, %v376_v32, 16 }
 0x296   :  { %v958_v37 = vsel %vm362_vm14, %v378_v34, 2147483647  ;;  %v380_v38 = vsel %vm362_vm14, %v377_v33, 2147483647  ;;  %v259_v39 = vsel %vm256_vm4, %v942_v26, 16  ;;  %vm346_vm1 = vcmask 7168  }
 0x297   :  { %v397_v41 = vshra.s32 %v958_v37, 16  ;;  %v382_v42 = vshra.s32 %v380_v38, 16  ;;  %v410_v43 = vsel %vm362_vm14, %v379_v35, 2147483647  ;;  %v442_v47 = vmul.f32 1.442695, %v438_v36 }
 0x298   :  { %v962_v40 = vpop.xlane.xlu0 %254  ;;  %v412_v46 = vshra.s32 %v410_v43, 16  ;;  %v262_v48 = vsel %vm246_vm15, %v259_v39, 2147483647  ;;  %v411_v6 = vand.u32 65535, %v410_v43  ;;  %v381_v9 = vand.u32 65535, %v380_v38  ;;  %v508_v38 = vld [vmem:[%s1097_s2 + $0x10] sm:$0xff] }
 0x299   :  { %vm258_vm5 = vcmp.eq.f32.partialorder %v923_v0, %v962_v40  ;;  %v399_v44 = vcvt.s32.f32 %v397_v41  ;;  %v384_v45 = vcvt.s32.f32 %v382_v42  ;;  %v264_v52 = vshra.s32 %v262_v48, 16  ;;  %v507_v39 = vld [vmem:[%s1097_s2 + $0x8] sm:$0xff]  ;;  %v506_v42 = vld [vmem:[%s1097_s2] sm:$0xff] }
 0x29a   :  { %v261_v49 = vsel %vm258_vm5, %v942_v26, 16  ;;  %v414_v51 = vcvt.s32.f32 %v412_v46  ;;  %747 = vpow2.f32 %v442_v47  ;;  %v413_v8 = vcvt.s32.f32 %v411_v6 }
 0x29b   :  { %400 = vmin.xlane.f32.xlu1 %v399_v44  ;;  %385 = vmin.xlane.f32.xlu0 %v384_v45  ;;  %v292_v53 = vsel %vm246_vm15, %v261_v49, 2147483647  ;;  %v266_v55 = vcvt.s32.f32 %v264_v52  ;;  %749 = vpow2.f32 %v440_v3  ;;  %v263_v10 = vand.u32 65535, %v262_v48 }
 0x29c   :  { %v970_v50 = vpop.xlane.xlu0 %251  ;;  %v294_v56 = vshra.s32 %v292_v53, 16  ;;  %v383_v14 = vcvt.s32.f32 %v381_v9  ;;  %v396_v16 = vand.u32 65535, %v958_v37  ;;  %v444_v23 = vmul.f32 1.442695, %v439_v22  ;;  %v509_v37 = vld [vmem:[%s1097_s2 + $0x18] sm:$0xff] }
 0x29d   :  { %vm257_vm6 = vcmp.eq.f32.partialorder %v929_v19, %v970_v50  ;;  %v265_v15 = vcvt.s32.f32 %v263_v10  ;;  %v293_v30 = vand.u32 65535, %v292_v53  ;;  %689 = vmatpush3.msra.mxu1 %v509_v37  ;;  %vm844_vm14 = vmmov 0  }
 0x29e   :  { %v260_v54 = vsel %vm257_vm6, %v942_v26, 16  ;;  %v296_v58 = vcvt.s32.f32 %v294_v56  ;;  %v398_v20 = vcvt.s32.f32 %v396_v16  ;;  %751 = vpow2.f32 %v444_v23  ;;  %690 = vmatprep.subr.mxu1 %v843_v25  ;;  %696 = vmatprep.mubr.msk.f32.mxu1 %vm844_vm14, %v843_v25 }
 0x29f   :  { %415 = vmin.xlane.f32.xlu0 %v414_v51  ;;  %v277_v57 = vsel %vm246_vm15, %v260_v54, 2147483647  ;;  %v295_v32 = vcvt.s32.f32 %v293_v30  ;;  %691 = vmatpush3.msra.mxu1 %v508_v38  ;;  %vm605_vm2 = vcmask 15360   ;;  %v318_v9 = vsub.f32 %v923_v0, %v962_v40 }
 0x2a0   :  { %v279_v59 = vshra.s32 %v277_v57, 16  ;;  %v278_v33 = vand.u32 65535, %v277_v57  ;;  %692 = vmatprep.subr.mxu1 %v843_v25 }
 0x2a1   :  { %693 = vmatpush3.msra.mxu1 %v507_v39 }
 0x2a2   :  { %v281_v61 = vcvt.s32.f32 %v279_v59  ;;  %v280_v35 = vcvt.s32.f32 %v278_v33  ;;  %694 = vmatprep.subr.mxu1 %v843_v25 }
 0x2a3   :  { %267 = vmin.xlane.f32.xlu0 %v266_v55  ;;  %695 = vmatpush3.msra.mxu1 %v506_v42 }
 0x2a7   :  { %297 = vmin.xlane.f32.xlu0 %v296_v58  ;;  %v748_v62 = vpop.eup %747 }
 0x2a8   :  { %v750_v4 = vpop.eup %749 }
 0x2ab   :  { %282 = vmin.xlane.f32.xlu0 %v281_v61  ;;  %v752_v27 = vpop.eup %751 }
 0x2ac   :  { %451 = vrot.lane.b32.xlu1 %v748_v62, %s842_s8 }
 0x2c1   :  { %449 = vrot.lane.b32.xlu0 %v750_v4, %s842_s8 }
 0x324   :  { %v980_v5 = vpop.xlane.xlu0 %385  ;;  %v986_v12 = vpop.xlane.xlu1 %400 }
 0x325   :  { %vm387_vm8 = vcmp.eq.f32.partialorder %v384_v45, %v980_v5  ;;  %vm402_vm10 = vcmp.eq.f32.partialorder %v399_v44, %v986_v12  ;;  %v392_v43 = vcvt.f32.s32 %v980_v5  ;;  %v407_v49 = vcvt.f32.s32 %v986_v12 }
 0x326   :  { %v388_v17 = vsel %vm387_vm8, %v383_v14, inf  ;;  %v403_v21 = vsel %vm402_vm10, %v398_v20, inf  ;;  %v321_v12 = vmul.f32 5.0, %v318_v9 }
 0x327   :  { %v408_v62 = vshll.u32 %v407_v49, 16 }
 0x328   :  { %v982_v7 = vpop.xlane.xlu0 %415  ;;  %v452_v44 = vpop.permute.xlu1 %451 }
 0x329   :  { %vm417_vm7 = vcmp.eq.f32.partialorder %v414_v51, %v982_v7  ;;  %v422_v46 = vcvt.f32.s32 %v982_v7  ;;  %v393_v51 = vshll.u32 %v392_v43, 16 }
 0x32a   :  { %v418_v11 = vsel %vm417_vm7, %v413_v8, inf  ;;  %v317_v8 = vsub.f32 %v929_v19, %v970_v50 }
 0x32b   :  { %419 = vmin.xlane.f32.xlu0 %v418_v11  ;;  %v423_v54 = vshll.u32 %v422_v46, 16  ;;  %v316_v11 = vsub.f32 %v925_v1, %v950_v31  ;;  %v461_v1 = vsel %vm246_vm15, %v452_v44, 0.0 }
 0x32c   :  { %v268_v13 = vpop.xlane.xlu0 %267  ;;  %v320_v10 = vmul.f32 5.0, %v317_v8 }
 0x32d   :  { %vm269_vm9 = vcmp.eq.f32.partialorder %v266_v55, %v268_v13  ;;  %v274_v47 = vcvt.f32.s32 %v268_v13  ;;  %v319_v14 = vmul.f32 5.0, %v316_v11 }
 0x32e   :  { %v270_v18 = vsel %vm269_vm9, %v265_v15, inf  ;;  %v324_v13 = vmul.f32 1.442695, %v320_v10  ;;  %v326_v15 = vmul.f32 1.442695, %v321_v12 }
 0x32f   :  { %389 = vmin.xlane.f32.xlu0 %v388_v17  ;;  %271 = vmin.xlane.f32.xlu1 %v270_v18  ;;  %v275_v55 = vshll.u32 %v274_v47, 16  ;;  %v322_v16 = vmul.f32 1.442695, %v319_v14 }
 0x330   :  { %v994_v29 = vpop.xlane.xlu0 %297  ;;  %753 = vpow2.f32 %v324_v13 }
 0x331   :  { %vm299_vm11 = vcmp.eq.f32.partialorder %v296_v58, %v994_v29  ;;  %755 = vpow2.f32 %v326_v15  ;;  %v304_v20 = vcvt.f32.s32 %v994_v29 }
 0x332   :  { %v300_v34 = vsel %vm299_vm11, %v295_v32, inf  ;;  %757 = vpow2.f32 %v322_v16 }
 0x333   :  { %404 = vmin.xlane.f32.xlu0 %v403_v21  ;;  %v305_v23 = vshll.u32 %v304_v20, 16 }
 0x334   :  { %v997_v28 = vpop.xlane.xlu0 %282 }
 0x335   :  { %vm284_vm12 = vcmp.eq.f32.partialorder %v281_v61, %v997_v28 }
 0x336   :  { %v285_v36 = vsel %vm284_vm12, %v280_v35, inf }
 0x338   :  { %v450_v41 = vpop.permute.xlu0 %449 }
 0x339   :  { %v458_v31 = vsel %vm246_vm15, %v450_v41, 0.0 }
 0x33d   :  { %v754_v17 = vpop.eup %753 }
 0x33e   :  { %v331_v18 = vsel %vm246_vm15, %v754_v17, 0.0  ;;  %v756_v2 = vpop.eup %755 }
 0x33f   :  { %v758_v19 = vpop.eup %757  ;;  %v334_v0 = vsel %vm246_vm15, %v756_v2, 0.0 }
 0x340   :  { %v328_v40 = vsel %vm246_vm15, %v758_v19, 0.0 }
 0x349   :  { %453 = vrot.lane.b32.xlu0 %v752_v27, %s842_s8  ;;  %v289_v27 = vcvt.f32.s32 %v997_v28 }
 0x368   :  { %301 = vmin.xlane.f32.xlu0 %v300_v34  ;;  %v290_v34 = vshll.u32 %v289_v27, 16 }
 0x36c   :  { %286 = vmin.xlane.f32.xlu0 %v285_v36 }
 0x3b4   :  { %v420_v45 = vpop.xlane.xlu0 %419 }
 0x3b5   :  { %v421_v48 = vcvt.f32.s32 %v420_v45 }
 0x3b7   :  { %v424_v58 = vadd.s32 %v423_v54, %v421_v48 }
 0x3b8   :  { %v272_v52 = vpop.xlane.xlu1 %271  ;;  %v390_v53 = vpop.xlane.xlu0 %389 }
 0x3b9   :  { %v273_v56 = vcvt.f32.s32 %v272_v52  ;;  %v391_v57 = vcvt.f32.s32 %v390_v53  ;;  %vm427_vm4 = vcmp.eq.s32.totalorder %v942_v26, %v424_v58 }
 0x3ba   :  { %v659_v6 = vsel %vm427_vm4, 1.0, %v843_v25 }
 0x3bb   :  { %v276_v59 = vadd.s32 %v275_v55, %v273_v56  ;;  %v394_v60 = vadd.s32 %v393_v51, %v391_v57 }
 0x3bc   :  { %v405_v61 = vpop.xlane.xlu0 %404 }
 0x3bd   :  { %v602_v63 = vsel %vm346_vm1, %v276_v59, %v394_v60  ;;  %v406_v3 = vcvt.f32.s32 %v405_v61  ;;  %vm425_vm3 = vcmp.eq.s32.totalorder %v942_v26, %v394_v60  ;;  %vm307_vm6 = vcmp.eq.s32.totalorder %v942_v26, %v276_v59 }
 0x3be   :  { %606 = vst.msk [vmem:[%s1100_s5] sm:$0xff] %vm605_vm2, %v602_v63  ;;  %v657_v4 = vsel %vm425_vm3, 1.0, %v843_v25  ;;  %v654_v28 = vsel %vm307_vm6, 1.0, %v843_v25 }
 0x3bf   :  { %v409_v5 = vadd.s32 %v408_v62, %v406_v3  ;;  %494 = vrot.lane.b32.xlu1 %v657_v4, %s841_s1 }
 0x3c0   :  { %v454_v50 = vpop.permute.xlu0 %453 }
 0x3c1   :  { %vm426_vm5 = vcmp.eq.s32.totalorder %v942_v26, %v409_v5  ;;  %v464_v21 = vsel %vm246_vm15, %v454_v50, 0.0 }
 0x3c2   :  { %v658_v7 = vsel %vm426_vm5, 1.0, %v843_v25 }
 0x3c3   :  { %498 = vrot.lane.b32.xlu1 %v659_v6, %s841_s1  ;;  %496 = vrot.lane.b32.xlu0 %v658_v7, %s841_s1 }
 0x3e2   :  { %332 = vadd.xlane.f32.xlu0 %v331_v18 }
 0x3e6   :  { %335 = vadd.xlane.f32.xlu0 %v334_v0 }
 0x3e7   :  { %329 = vadd.xlane.f32.xlu1 %v328_v40 }
 0x3ea   :  { %462 = vadd.xlane.f32.xlu0 %v461_v1 }
 0x3eb   :  { %459 = vadd.xlane.f32.xlu1 %v458_v31 }
 0x3ef   :  { %465 = vadd.xlane.f32.xlu1 %v464_v21 }
 0x3f1   :  { %v302_v22 = vpop.xlane.xlu0 %301 }
 0x3f2   :  { %v303_v30 = vcvt.f32.s32 %v302_v22 }
 0x3f4   :  { %v306_v32 = vadd.s32 %v305_v23, %v303_v30 }
 0x3f5   :  { %v287_v33 = vpop.xlane.xlu0 %286 }
 0x3f6   :  { %v604_v35 = vsel %vm346_vm1, %v306_v32, %v424_v58  ;;  %v288_v36 = vcvt.f32.s32 %v287_v33  ;;  %vm309_vm8 = vcmp.eq.s32.totalorder %v942_v26, %v306_v32 }
 0x3f7   :  { %608 = vst.msk [vmem:[%s1100_s5 + $0x10] sm:$0xff] %vm605_vm2, %v604_v35  ;;  %v656_v45 = vsel %vm309_vm8, 1.0, %v843_v25 }
 0x3f8   :  { %v291_v29 = vadd.s32 %v290_v34, %v288_v36 }
 0x3fa   :  { %v603_v37 = vsel %vm346_vm1, %v291_v29, %v409_v5  ;;  %vm308_vm7 = vcmp.eq.s32.totalorder %v942_v26, %v291_v29  ;;  %v227_v26 = vshrl.u32 %v226_v24, 7 }
 0x3fb   :  { %607 = vst.msk [vmem:[%s1100_s5 + $0x8] sm:$0xff] %vm605_vm2, %v603_v37  ;;  %v655_v41 = vsel %vm308_vm7, 1.0, %v843_v25  ;;  %s845_s5 = smov [#allocation5]  }
 0x3fc   :  { %v229_v53 = vadd.s32 16, %v227_v26  ;;  %s617_s24 = sshll.u32 %s845_s5, 4  ;;  %s618_s24 = int_to_ptr.vmem [resolvable:$true] %s617_s24 }
 0x3fd   :  { %s791_s25 = scalar_lea.vmem %s618_s24, 384  ;;  %p796_p6 = scmp.lt.s32.totalorder %s618_s24, %s618_s24 }
 0x3fe   :  { %vm237_vm9 = vcmp.lt.s32.totalorder %v229_v53, 18  ;;  %p792_p5 = scmp.ne.s32.totalorder %s618_s24, %s791_s25  ;;  %p797_p7 = scmp.lt.s32.totalorder %s791_s25, %s791_s25 }
 0x3ff   :  { %v653_v58 = vsel %vm237_vm9, 1.0, %v843_v25 }
 0x400   :  { %p798_p8 = por %p797_p7, %p796_p6 }
 0x402   :  { %p799_p9 = pnand %p798_p8, %p792_p5 }
 0x431   :  { %v495_v38 = vpop.permute.xlu1 %494 }
 0x432   :  { %v503_v39 = vsel %vm246_vm15, %v654_v28, %v495_v38 }
 0x433   :  { %697 = vmatmul.mubr.msk.f32.vlgmr.msra.gmra.mxu1 %vm40_vm0, %v503_v39 }
 0x434   :  { %699 = vmatprep.mubr.msk.f32.mxu1 %vm844_vm14, %v843_v25 }
 0x435   :  { %v497_v42 = vpop.permute.xlu0 %496  ;;  %v499_v44 = vpop.permute.xlu1 %498 }
 0x436   :  { %v504_v43 = vsel %vm246_vm15, %v655_v41, %v497_v42  ;;  %v505_v46 = vsel %vm246_vm15, %v656_v45, %v499_v44 }
 0x437   :  { %700 = vmatmul.mubr.msk.f32.gmra.mxu1 %vm40_vm0, %v504_v43 }
 0x438   :  { %702 = vmatprep.mubr.msk.f32.mxu1 %vm844_vm14, %v843_v25 }
 0x43b   :  { %703 = vmatmul.mubr.msk.f32.gmra.mxu1 %vm40_vm0, %v505_v46 }
 0x46b   :  { %v333_v47 = vpop.xlane.xlu0 %332 }
 0x46c   :  { %759 = vlog2.f32 %v333_v47 }
 0x46f   :  { %v336_v48 = vpop.xlane.xlu0 %335 }
 0x470   :  { %761 = vlog2.f32 %v336_v48  ;;  %v330_v49 = vpop.xlane.xlu1 %329 }
 0x471   :  { %763 = vlog2.f32 %v330_v49 }
 0x473   :  { %v463_v51 = vpop.xlane.xlu0 %462 }
 0x474   :  { %765 = vlog2.f32 %v463_v51  ;;  %v460_v52 = vpop.xlane.xlu1 %459 }
 0x475   :  { %767 = vlog2.f32 %v460_v52 }
 0x478   :  { %v466_v54 = vpop.xlane.xlu1 %465 }
 0x479   :  { %769 = vlog2.f32 %v466_v54  ;;  %v760_v55 = vpop.eup %759 }
 0x47a   :  { %v340_v57 = vmul.f32 0.6931472, %v760_v55 }
 0x47c   :  { %v348_v3 = vsel %vm346_vm1, %v340_v57, 0.0 }
 0x47d   :  { %v762_v56 = vpop.eup %761 }
 0x47e   :  { %v764_v59 = vpop.eup %763  ;;  %v342_v60 = vmul.f32 0.6931472, %v762_v56 }
 0x47f   :  { %v338_v61 = vmul.f32 0.6931472, %v764_v59 }
 0x480   :  { %v345_v62 = vmul.f32 %v653_v58, %v342_v60 }
 0x481   :  { %v766_v63 = vpop.eup %765  ;;  %v347_v24 = vsel %vm346_vm1, %v338_v61, 0.0 }
 0x482   :  { %v768_v4 = vpop.eup %767  ;;  %v349_v5 = vadd.f32 %v348_v3, %v347_v24  ;;  %v350_v6 = vsel %vm346_vm1, %v345_v62, 0.0  ;;  %v470_v7 = vmul.f32 0.6931472, %v766_v63 }
 0x483   :  { %v468_v8 = vmul.f32 0.6931472, %v768_v4 }
 0x484   :  { %v351_v9 = vadd.f32 %v350_v6, %v349_v5  ;;  %v477_v12 = vsel %vm346_vm1, %v470_v7, 0.0 }
 0x485   :  { %v476_v25 = vsel %vm346_vm1, %v468_v8, 0.0 }
 0x486   :  { %v770_v10 = vpop.eup %769  ;;  %352 = vadd.xlane.f32.xlu0 %v351_v9  ;;  %v478_v14 = vadd.f32 %v477_v12, %v476_v25 }
 0x487   :  { %v472_v11 = vmul.f32 0.6931472, %v770_v10 }
 0x489   :  { %v475_v13 = vmul.f32 %v653_v58, %v472_v11 }
 0x48b   :  { %v479_v15 = vsel %vm346_vm1, %v475_v13, 0.0 }
 0x48c   :  { %v480_v16 = vadd.f32 %v479_v15, %v478_v14 }
 0x48e   :  { %481 = vadd.xlane.f32.xlu1 %v480_v16 }
 0x4f3   :  { %v585_v17 = vpop.f32.mrf.mxu1 }
 0x4f4   :  { %599 = vst.msk [vmem:[#allocation5] sm:$0xff] %vm173_vm13, %v585_v17 }
 0x4f5   :  { %v698_v18 = vpop.f32.mrf.mxu1 }
 0x4f7   :  { %v590_v2 = vpop.f32.mrf.mxu1 }
 0x4f8   :  { %600 = vst.msk [vmem:[#allocation5 + $0x8] sm:$0xff] %vm173_vm13, %v590_v2 }
 0x4f9   :  { %v701_v19 = vpop.f32.mrf.mxu1 }
 0x4fb   :  { %v595_v0 = vpop.f32.mrf.mxu1 }
 0x4fc   :  { %601 = vst.msk [vmem:[#allocation5 + $0x10] sm:$0xff] %vm173_vm13, %v595_v0 }
 0x4fd   :  { %v704_v40 = vpop.f32.mrf.mxu1 }
 0x4fe   :  { %802 = shalt.err (!%p799_p9)
}
 0x4ff   :  { %623 = dma.vmem_to_hbm [thread:$0]  %s618_s24, 384, %s1098_s3, [#allocation4], %s838_s21, %s838_s21, %s839_s22   ;;  %vm610_vm0 = vcmask 8192  }
 0x500   :  { %s846_s28 = smov [#allocation6]  }
 0x501   :  { %s630_s29 = sshll.u32 %s846_s28, 4  ;;  %s631_s29 = int_to_ptr.vmem [resolvable:$true] %s630_s29 }
 0x502   :  { %s811_s21 = scalar_lea.vmem %s631_s29, 16  ;;  %s815_s22 = scalar_lea.vmem %s631_s29, 32 }
 0x503   :  { %p812_p10 = scmp.ne.s32.totalorder %s631_s29, %s811_s21  ;;  %p816_p11 = scmp.lt.s32.totalorder %s631_s29, %s631_s29 }
 0x504   :  { %p817_p12 = scmp.lt.s32.totalorder %s815_s22, %s811_s21 }
 0x506   :  { %p818_p13 = por %p817_p12, %p816_p11 }
 0x508   :  { %p819_p0 = pnand %p818_p13, %p812_p10 }
 0x50f   :  { %v353_v1 = vpop.xlane.xlu0 %352 }
 0x510   :  { %v354_v31 = vrot.slane %v353_v1, 4 }
 0x512   :  { %v355_v50 = vadd.f32 %v354_v31, %v353_v1 }
 0x514   :  { %v356_v20 = vrot.slane %v355_v50, 2 }
 0x516   :  { %v357_v21 = vadd.f32 %v356_v20, %v355_v50 }
 0x517   :  { %v482_v22 = vpop.xlane.xlu1 %481 }
 0x518   :  { %v483_v23 = vrot.slane %v482_v22, 4  ;;  %v358_v27 = vrot.slane %v357_v21, 1 }
 0x51a   :  { %v484_v30 = vadd.f32 %v483_v23, %v482_v22  ;;  %v359_v32 = vadd.f32 %v358_v27, %v357_v21 }
 0x51c   :  { %v485_v33 = vrot.slane %v484_v30, 2  ;;  %705 = vpush %v359_v32 }
 0x51e   :  { %v486_v34 = vadd.f32 %v485_v33, %v484_v30 }
 0x520   :  { %v487_v35 = vrot.slane %v486_v34, 1 }
 0x522   :  { %v488_v36 = vadd.f32 %v487_v35, %v486_v34 }
 0x524   :  { %707 = vpush %v488_v36 }
 0x54d   :  { %s706_s27 = spop %705 }
 0x54e   :  { %v361_v29 = vstv %s706_s27 }
 0x555   :  { %s708_s3 = spop %707 }
 0x556   :  { %v490_v37 = vstv %s708_s3 }
 0x557   :  { %v609_v28 = vsel %vm346_vm1, %v361_v29, %v490_v37 }
 0x558   :  { %611 = vst.msk [vmem:[#allocation6] sm:$0x1] %vm610_vm0, %v609_v28 }
 0x559   :  { %822 = shalt.err (!%p819_p0)
}
 0x55a   :  { %633 = dma.vmem_to_hbm [thread:$0]  %s631_s29, 16, %s1099_s4, [#allocation7]  }
 0x55b   :  { %833 = dma.done.wait [#allocation4], 384  }
 0x55c   :  { %834 = vsyncadd [#allocation4], 4294966912 }
 0x55d   :  { %835 = dma.done.wait [#allocation7], 16  }
 0x55e   :  { %836 = vsyncadd [#allocation7], 4294967280 }
 0x55f   :  { %644 = vsyncpa [#allocation3], 1 }
 0x560   :  { %645 = vsyncpa [#allocation4], 1 }
 0x561   :  { %646 = vsyncpa [#allocation7], 1 }

</bundles_post_ra>
